<compile_context>
chip_gen: v6e
topology: v6e:2x2x1
jax: 0.10.0
libtpu: 0.0.40
codegen_flags: <defaults>
</compile_context>

<pallas_src>
import functools

import jax
import jax.numpy as jnp
import numpy as np
from jax.experimental import pallas as pl
from jax.experimental.pallas import tpu as pltpu


# ----------------------------- sizing helpers ------------------------------

@functools.lru_cache(maxsize=None)
def _vmem_limit_bytes():
    """~75% of this chip's VMEM (96 MiB v5e/v6e, 48 MiB per-TC v7x); falls back
    to the portable 32 MiB scoped default if the query is unavailable."""
    try:
        return int(pltpu.get_tpu_info().vmem_capacity_bytes * 3 // 4)
    except Exception:  # older jax / non-queryable backend
        return 32 * 1024 * 1024


def _compiler_params(semantics):
    return pltpu.CompilerParams(dimension_semantics=semantics,
                                vmem_limit_bytes=_vmem_limit_bytes())


def _pick_row_tile(m, row_bytes, *, target_bytes=2 << 20):
    """Byte-budget row tile (~2 MiB per streamed block).  If the whole extent
    fits a single block and is large enough, split it in two so v7x's two
    TensorCores both get a parallel grid step (harmless on 1-TC chips)."""
    t = int(max(8, target_bytes // max(int(row_bytes), 1)))
    t = min(t, int(m))
    if t >= m:
        if m >= 256:
            t = ((m + 1) // 2 + 7) // 8 * 8
        else:
            t = m
    else:
        t = max(8, (t // 8) * 8)
    return t


# ----------------------------- Pallas kernels ------------------------------

def _linear_kernel(x_ref, w_ref, b_ref, o_ref):
    # o = x @ w + b.  Matmul operands take the weight's dtype (bf16 fast path),
    # accumulation and bias-add stay f32.
    x = x_ref[...].astype(w_ref.dtype)
    y = jnp.dot(x, w_ref[...], preferred_element_type=jnp.float32)
    y = y + b_ref[...].astype(jnp.float32)
    o_ref[...] = y.astype(o_ref.dtype)


def pallas_linear(x, w, b):
    """x: [M, K] @ w: [K, Nout] + b: [Nout] -> [M, Nout], row-tiled."""
    M, K = x.shape
    Nout = w.shape[1]
    tm = _pick_row_tile(M, (K + Nout) * 4)
    return pl.pallas_call(
        _linear_kernel,
        out_shape=jax.ShapeDtypeStruct((M, Nout), x.dtype),
        grid=(pl.cdiv(M, tm),),
        in_specs=[
            pl.BlockSpec((tm, K), lambda i: (i, 0)),
            pl.BlockSpec((K, Nout), lambda i: (0, 0)),   # weight VMEM-resident
            pl.BlockSpec((1, Nout), lambda i: (0, 0)),
        ],
        out_specs=pl.BlockSpec((tm, Nout), lambda i: (i, 0)),
        compiler_params=_compiler_params(("parallel",)),
    )(x, w, b.reshape(1, Nout))


def _sr_conv_ln_kernel(x_ref, w_ref, b_ref, g_ref, bb_ref, o_ref, *, eps):
    # Fused sequence-reduction Conv2d(k=stride=R) + bias + LayerNorm.
    # x_ref: [R, Wr, R*C] -- one strip of R image rows, patches already
    #        contiguous along lanes (pure wrapper-side reshape, no transpose).
    # w_ref: [R, R*C, C]  -- conv weight rearranged once in prepare_params.
    R = x_ref.shape[0]
    acc = b_ref[...].astype(jnp.float32)                       # [1, C] -> broadcasts
    for r in range(R):
        xr = x_ref[r].astype(w_ref.dtype)                      # [Wr, R*C]
        acc = acc + jnp.dot(xr, w_ref[r], preferred_element_type=jnp.float32)
    y = acc                                                    # [Wr, C]
    mean = jnp.mean(y, axis=-1, keepdims=True)
    var = jnp.mean(jnp.square(y - mean), axis=-1, keepdims=True)  # biased, like torch
    y = (y - mean) * jax.lax.rsqrt(var + eps)
    y = y * g_ref[...].astype(jnp.float32) + bb_ref[...].astype(jnp.float32)
    o_ref[...] = y.astype(o_ref.dtype)


def pallas_sr_conv_layernorm(x_patches, w, b, gamma, beta, eps):
    """x_patches: [B, Hr, R, Wr, R*C] (free reshape of hidden_states) ->
    sequence-reduced, LayerNormed kv input [B, Hr*Wr, C]."""
    B, Hr, R, Wr, RC = x_patches.shape
    C = w.shape[-1]
    Nr = Hr * Wr
    return pl.pallas_call(
        functools.partial(_sr_conv_ln_kernel, eps=eps),
        out_shape=jax.ShapeDtypeStruct((B, Nr, C), jnp.float32),
        grid=(B, Hr),
        in_specs=[
            pl.BlockSpec((None, None, R, Wr, RC), lambda b, h: (b, h, 0, 0, 0)),
            pl.BlockSpec((R, RC, C), lambda b, h: (0, 0, 0)),  # weight resident
            pl.BlockSpec((1, C), lambda b, h: (0, 0)),
            pl.BlockSpec((1, C), lambda b, h: (0, 0)),
            pl.BlockSpec((1, C), lambda b, h: (0, 0)),
        ],
        out_specs=pl.BlockSpec((None, Wr, C), lambda b, h: (b, h, 0)),
        compiler_params=_compiler_params(("parallel", "parallel")),
    )(x_patches, w, b.reshape(1, C), gamma.reshape(1, C), beta.reshape(1, C))


def _attention_kernel(q_ref, kv_ref, o_ref, *, num_heads, head_dim, scale,
                      matmul_dtype):
    # q_ref : [tq, C]   query rows, heads contiguous along channels
    # kv_ref: [Nr, 2C]  K in cols [0, C), V in cols [C, 2C)  (VMEM-resident)
    # o_ref : [tq, C]   lane-dense context
    C = num_heads * head_dim
    q = (q_ref[...].astype(jnp.float32) * scale).astype(matmul_dtype)
    kv = kv_ref[...].astype(matmul_dtype)
    for h in range(num_heads):
        lo = h * head_dim
        qh = q[:, lo:lo + head_dim]                     # [tq, d]
        kh = kv[:, lo:lo + head_dim]                    # [Nr, d]
        vh = kv[:, C + lo:C + lo + head_dim]            # [Nr, d]
        # Contract on dim 1 of both operands: no explicit k.T / XLU transpose.
        s = jax.lax.dot_general(
            qh, kh, dimension_numbers=(((1,), (1,)), ((), ())),
            preferred_element_type=jnp.float32)         # [tq, Nr], f32
        m = jnp.max(s, axis=-1, keepdims=True)
        p = jnp.exp(s - m)
        denom = jnp.sum(p, axis=-1, keepdims=True)
        probs = p * pl.reciprocal(denom, approx=True)   # divide -> EUP slot
        # TODO(synk): training-mode dropout on attention probs not implemented.
        ctx = jnp.dot(probs.astype(matmul_dtype), vh,
                      preferred_element_type=jnp.float32)
        # Direct per-head store (review item): no concatenate, bounded live ranges.
        o_ref[:, lo:lo + head_dim] = ctx.astype(o_ref.dtype)


def pallas_attention(q, kv, num_heads, *, matmul_dtype=jnp.float32):
    """q: [B, N, C], kv: [B, Nr, 2C] -> context [B, N, C].

    Grid = (B, ceil(N/tq)); the K/V block index ignores the q-tile axis, so the
    reduced-sequence K/V stays VMEM-resident while query tiles stream through
    with double-buffered pipelining.
    """
    B, N, C = q.shape
    Nr = kv.shape[1]
    head_dim = C // num_heads
    scale = float(head_dim) ** (-0.5)
    # budget: q tile + per-head score/prob rows, f32
    tq = _pick_row_tile(N, (C + 2 * Nr) * 4)
    # TODO(synk): for sr_ratio==1 stages with very large N the resident [N, 2C]
    # K/V block should move onto a kv grid axis with flash-style online-softmax
    # accumulation instead of shrinking tq.
    return pl.pallas_call(
        functools.partial(_attention_kernel, num_heads=num_heads,
                          head_dim=head_dim, scale=scale,
                          matmul_dtype=matmul_dtype),
        out_shape=jax.ShapeDtypeStruct((B, N, C), q.dtype),
        grid=(B, pl.cdiv(N, tq)),
        in_specs=[
            pl.BlockSpec((None, tq, C), lambda b, i: (b, i, 0)),
            pl.BlockSpec((None, Nr, 2 * C), lambda b, i: (b, 0, 0)),
        ],
        out_specs=pl.BlockSpec((None, tq, C), lambda b, i: (b, i, 0)),
        compiler_params=_compiler_params(("parallel", "parallel")),
    )(q, kv)


# ------------------------------ Module wrapper ------------------------------

def prepare_params(params, sr_ratio, matmul_dtype=jnp.bfloat16):
    """One-time parameter prep (transposes / concats / dtype), hoisted out of
    the per-call forward (review item)."""
    wdt = matmul_dtype
    C = params["wq"].shape[0]
    p = {}
    if sr_ratio == 1:
        # Fused QKV projection: one HBM read of hidden_states, Nout = 3C.
        p["wqkv"] = jnp.concatenate(
            [params["wq"].T, params["wk"].T, params["wv"].T], axis=1).astype(wdt)
        p["bqkv"] = jnp.concatenate(
            [params["bq"], params["bk"], params["bv"]]).astype(jnp.float32)
    else:
        p["wq"] = params["wq"].T.astype(wdt)
        p["bq"] = params["bq"].astype(jnp.float32)
        p["wkv"] = jnp.concatenate(
            [params["wk"].T, params["wv"].T], axis=1).astype(wdt)
        p["bkv"] = jnp.concatenate([params["bk"], params["bv"]]).astype(jnp.float32)
        R = sr_ratio
        # conv weight [Cout, Cin, R, R] -> [r, c*C + cin, cout] = [R, R*C, C]
        p["w_sr"] = params["w_sr"].transpose(2, 3, 1, 0).reshape(R, R * C, C).astype(wdt)
        p["b_sr"] = params["b_sr"].astype(jnp.float32)
        p["ln_g"] = params["ln_g"].astype(jnp.float32)
        p["ln_b"] = params["ln_b"].astype(jnp.float32)
    return p


def segformer_efficient_self_attention(hidden_states, prepped, height, width,
                                        num_heads, sr_ratio, eps=1e-6):
    """Forward pass matching the PyTorch module (eval mode)."""
    B, N, C = hidden_states.shape
    assert C % num_heads == 0
    x2 = hidden_states.reshape(B * N, C)

    if sr_ratio > 1:
        mm_dtype = prepped["wkv"].dtype
        # --- query projection ---
        q = pallas_linear(x2, prepped["wq"], prepped["bq"]).reshape(B, N, C)
        # --- fused sequence reduction (Conv2d k=stride=R) + LayerNorm ---
        R = sr_ratio
        Hr, Wr = height // R, width // R
        # Pure contiguous reshape (no transpose / extra HBM pass): the kernel's
        # BlockSpec + in-kernel per-r matmuls do the patch assembly.
        x_patches = hidden_states.reshape(B, Hr, R, Wr, R * C)
        kv_in = pallas_sr_conv_layernorm(x_patches, prepped["w_sr"],
                                         prepped["b_sr"], prepped["ln_g"],
                                         prepped["ln_b"], eps)
        Nr = Hr * Wr
        # --- fused K/V projection: one pass over kv_in with a [C, 2C] weight ---
        kv = pallas_linear(kv_in.reshape(B * Nr, C), prepped["wkv"],
                           prepped["bkv"]).reshape(B, Nr, 2 * C)
    else:
        mm_dtype = prepped["wqkv"].dtype
        # --- fused Q/K/V projection: single [C, 3C] matmul, one HBM read of x ---
        qkv = pallas_linear(x2, prepped["wqkv"], prepped["bqkv"]).reshape(B, N, 3 * C)
        q = qkv[:, :, :C]
        kv = qkv[:, :, C:]
        Nr = N

    # --- attention; output already in [B, N, C] head-contiguous channel layout ---
    return pallas_attention(q, kv, num_heads, matmul_dtype=mm_dtype)


# --------------------------- Pure-JAX reference -----------------------------

def reference_forward(hidden_states, params, height, width, num_heads, sr_ratio,
                      eps=1e-6):
    B, N, C = hidden_states.shape
    head_dim = C // num_heads
    q = hidden_states @ params["wq"].T + params["bq"]
    hs = hidden_states
    if sr_ratio > 1:
        x = hs.transpose(0, 2, 1).reshape(B, C, height, width)
        x = jax.lax.conv_general_dilated(
            x, params["w_sr"], window_strides=(sr_ratio, sr_ratio),
            padding="VALID", dimension_numbers=("NCHW", "OIHW", "NCHW"))
        x = x + params["b_sr"].reshape(1, C, 1, 1)
        hs = x.reshape(B, C, -1).transpose(0, 2, 1)
        mean = jnp.mean(hs, axis=-1, keepdims=True)
        var = jnp.mean((hs - mean) ** 2, axis=-1, keepdims=True)
        hs = (hs - mean) / jnp.sqrt(var + eps) * params["ln_g"] + params["ln_b"]
    k = hs @ params["wk"].T + params["bk"]
    v = hs @ params["wv"].T + params["bv"]
    qh = q.reshape(B, N, num_heads, head_dim).transpose(0, 2, 1, 3)
    kh = k.reshape(B, -1, num_heads, head_dim).transpose(0, 2, 1, 3)
    vh = v.reshape(B, -1, num_heads, head_dim).transpose(0, 2, 1, 3)
    scale = float(head_dim) ** (-0.5)
    s = jnp.einsum("bhnd,bhmd->bhnm", qh, kh) * scale
    p = jax.nn.softmax(s, axis=-1)
    ctx = jnp.einsum("bhnm,bhmd->bhnd", p, vh)
    return ctx.transpose(0, 2, 1, 3).reshape(B, N, C)


# ---------------------------------- main ------------------------------------

if __name__ == "__main__":
    B = 2
    H = W = 16
    C = 32            # hidden_size
    NUM_HEADS = 2
    SR_RATIO = 2
    EPS = 1e-6
    N = H * W

    key = jax.random.PRNGKey(0)
    ks = jax.random.split(key, 10)
    params = {
        "wq": 0.05 * jax.random.normal(ks[0], (C, C), jnp.float32),
        "bq": 0.05 * jax.random.normal(ks[1], (C,), jnp.float32),
        "wk": 0.05 * jax.random.normal(ks[2], (C, C), jnp.float32),
        "bk": 0.05 * jax.random.normal(ks[3], (C,), jnp.float32),
        "wv": 0.05 * jax.random.normal(ks[4], (C, C), jnp.float32),
        "bv": 0.05 * jax.random.normal(ks[5], (C,), jnp.float32),
        "w_sr": 0.05 * jax.random.normal(ks[6], (C, C, SR_RATIO, SR_RATIO), jnp.float32),
        "b_sr": 0.05 * jax.random.normal(ks[7], (C,), jnp.float32),
        "ln_g": 1.0 + 0.05 * jax.random.normal(ks[8], (C,), jnp.float32),
        "ln_b": 0.05 * jax.random.normal(ks[9], (C,), jnp.float32),
    }
    hidden_states = jax.random.normal(jax.random.PRNGKey(42), (B, N, C), jnp.float32)

    ref = jax.block_until_ready(
        reference_forward(hidden_states, params, H, W, NUM_HEADS, SR_RATIO, EPS))

    # (1) f32 matmul-operand mode: closest to PyTorch f32 semantics.
    #     (tolerance allows approx-reciprocal softmax + TPU default matmul precision
    #      in the XLA reference)
    pp_f32 = prepare_params(params, SR_RATIO, matmul_dtype=jnp.float32)
    out_f32 = jax.block_until_ready(segformer_efficient_self_attention(
        hidden_states, pp_f32, H, W, NUM_HEADS, SR_RATIO, EPS))
    np.testing.assert_allclose(np.asarray(out_f32), np.asarray(ref),
                               rtol=2e-2, atol=5e-3)
    assert out_f32.shape == (B, N, C)

    # (2) bf16 matmul-operand mode (v6e/v7x MXU fast path; f32 accumulation and
    #     f32 softmax/LayerNorm math) -> looser tolerance vs the f32 reference.
    pp_bf16 = prepare_params(params, SR_RATIO, matmul_dtype=jnp.bfloat16)
    out_bf16 = jax.block_until_ready(segformer_efficient_self_attention(
        hidden_states, pp_bf16, H, W, NUM_HEADS, SR_RATIO, EPS))
    np.testing.assert_allclose(np.asarray(out_bf16), np.asarray(ref),
                               rtol=1e-1, atol=2e-2)
    assert out_bf16.shape == (B, N, C)

    print("KERNEL_OK")
</pallas_src>

<mosaic_0001>
module attributes {stable_mosaic.version = 11 : i64} {
  func.func @_linear_kernel(%arg0: i32, %arg1: memref<256x32xf32, #tpu.memory_space<vmem>>, %arg2: memref<32x32xf32, #tpu.memory_space<vmem>>, %arg3: memref<1x32xf32, #tpu.memory_space<vmem>>, %arg4: memref<256x32xf32, #tpu.memory_space<vmem>>) attributes {dimension_semantics = [#tpu.dimension_semantics<parallel>], iteration_bounds = array<i64: 2>, scalar_prefetch = 0 : i64, scratch_operands = 0 : i64, tpu.core_type = #tpu.core_type<tc>, window_params = [{transform_indices = @transform_0, window_bounds = array<i64: 256, 32>}, {pipeline_mode = #tpu.pipeline_mode<synchronous>, transform_indices = @transform_1, window_bounds = array<i64: 32, 32>}, {pipeline_mode = #tpu.pipeline_mode<synchronous>, transform_indices = @transform_2, window_bounds = array<i64: 1, 32>}, {transform_indices = @transform_3, window_bounds = array<i64: 256, 32>}]} {
    %c0 = arith.constant 0 : index
    %c0_0 = arith.constant 0 : index
    %0 = vector.load %arg1[%c0, %c0_0] : memref<256x32xf32, #tpu.memory_space<vmem>>, vector<256x32xf32>
    %c0_1 = arith.constant 0 : index
    %c0_2 = arith.constant 0 : index
    %1 = vector.load %arg2[%c0_1, %c0_2] : memref<32x32xf32, #tpu.memory_space<vmem>>, vector<32x32xf32>
    %cst = arith.constant dense<0.000000e+00> : vector<256x32xf32>
    %2 = tpu.matmul %0, %1, %cst {dimension_numbers = #tpu.dot_dimension_numbers<[1], [0], [0], [1], [0, 0, 1, 1], [], []>} : vector<256x32xf32>, vector<32x32xf32>, vector<256x32xf32> -> vector<256x32xf32>
    %c0_3 = arith.constant 0 : index
    %c0_4 = arith.constant 0 : index
    %3 = vector.load %arg3[%c0_3, %c0_4] : memref<1x32xf32, #tpu.memory_space<vmem>>, vector<1x32xf32>
    %4 = vector.broadcast %3 : vector<1x32xf32> to vector<256x32xf32>
    %5 = arith.addf %2, %4 : vector<256x32xf32>
    %c0_5 = arith.constant 0 : index
    %c0_6 = arith.constant 0 : index
    %6 = vector.load %arg4[%c0_5, %c0_6] : memref<256x32xf32, #tpu.memory_space<vmem>>, vector<256x32xf32>
    tpu.vector_store %arg4[%c0_5, %c0_6], %5 {strides = array<i32>} : memref<256x32xf32, #tpu.memory_space<vmem>>, vector<256x32xf32>,
    return
  }
  func.func @transform_0(%arg0: i32) -> (i32, i32) {
    %c0_i32 = arith.constant 0 : i32
    %c0_i32_0 = arith.constant 0 : i32
    return %arg0, %c0_i32 : i32, i32
  }
  func.func @transform_1(%arg0: i32) -> (i32, i32) {
    %c0_i32 = arith.constant 0 : i32
    %c0_i32_0 = arith.constant 0 : i32
    %c0_i32_1 = arith.constant 0 : i32
    return %c0_i32, %c0_i32_0 : i32, i32
  }
  func.func @transform_2(%arg0: i32) -> (i32, i32) {
    %c0_i32 = arith.constant 0 : i32
    %c0_i32_0 = arith.constant 0 : i32
    %c0_i32_1 = arith.constant 0 : i32
    return %c0_i32, %c0_i32_0 : i32, i32
  }
  func.func @transform_3(%arg0: i32) -> (i32, i32) {
    %c0_i32 = arith.constant 0 : i32
    %c0_i32_0 = arith.constant 0 : i32
    return %arg0, %c0_i32 : i32, i32
  }
}

</mosaic_0001>

<bundles_post_ra>
// kernel: tpu_custom_call.1
= control target key start
LH: loop header
LB: loop body
LE: loop exit
PB: predicated region body
PF: predicated region fallthrough
CT: control target
= control target key end

     0   :  { %s807_s12 = smov 0   ;;  %s1012_s0 = inlined_call_operand.vmem [shape: f32[512,32], index: 0, kind: input, shape index: {}]   ;;  %s1013_s1 = inlined_call_operand.vmem [shape: f32[32,32], index: 1, kind: input, shape index: {}]   ;;  %s1014_s2 = inlined_call_operand.vmem [shape: f32[1,32], index: 2, kind: input, shape index: {}]   ;;  %s1015_s3 = inlined_call_operand.vmem [shape: f32[512,32], index: 3, kind: output, shape index: {}]  }
   0x1 LB: > { %s627_s13 = sadd.s32 4294967295, %s785_s12   ;;  %p631_p0 = scmp.ge.s32.totalorder %s785_s12, 1  ;;  %s785_s12 = sphi %s807_s12, %s13_s12  }
   0x2   : > { %p138_p1 = scmp.lt.s32.totalorder %s785_s12, 3 }
   0x4   : > { %p139_p2 = pnand %p631_p0, %p138_p1 }
   0x5   : > { %s632_s18 = sshll.u32 (!%p139_p2), %s627_s13, 5 }
   0x6   : > { %142 = sbr.rel (%p139_p2) target bundleno = 247 (0xf7), region = 32  ;;  %p163_p3 = scmp.lt.s32.totalorder (!%p139_p2), %s632_s18, 63 }
   0xb   : > { %v209_v0 = vld [vmem:[%s1013_s1 + $0x18] sm:$0xff]  ;;  %v208_v1 = vld [vmem:[%s1013_s1 + $0x10] sm:$0xff]  ;;  %v207_v2 = vld [vmem:[%s1013_s1 + $0x8] sm:$0xff]  ;;  %s1017_s18 = smov (!%p163_p3, %s632_s18), 63  ;;  %vm217_vm0 = vcmask 261120  }
   0xc   : > { %707 = vmatprep.subr.mxu0 %v209_v0  ;;  %763 = vmatprep.subr.mxu1 %v209_v0  ;;  %v206_v3 = vld [vmem:[%s1013_s1] sm:$0xff]  ;;  %s633_s23 = sshll.u32 %s1017_s18, 3 }
   0xd   : > { %708 = vmatpush3.msra.mxu0 %v209_v0  ;;  %767 = vmatpush3.msra.mxu1 %v209_v0  ;;  %s835_s26 = scalar_lea.vmem %s1012_s0, %s633_s23  ;;  %v904_v36 = vld [vmem:[%s1014_s2] ss:$0 sm:$0xff]  ;;  %s911_s4 = scalar_lea.vmem %s1015_s3, %s633_s23 }
   0xe   : > { %709 = vmatprep.subr.mxu0 %v208_v1  ;;  %764 = vmatprep.subr.mxu1 %v208_v1  ;;  %v174_v4 = vld [vmem:[%s835_s26] sm:$0xff]  ;;  %v175_v6 = vld [vmem:[%s835_s26 + $0x8] sm:$0xff]  ;;  %v176_v8 = vld [vmem:[%s835_s26 + $0x10] sm:$0xff] }
   0xf   : > { %710 = vmatpush3.msra.mxu0 %v208_v1  ;;  %768 = vmatpush3.msra.mxu1 %v208_v1  ;;  %v190_v5 = vld [vmem:[%s835_s26 + $0x80] sm:$0xff]  ;;  %v191_v7 = vld [vmem:[%s835_s26 + $0x88] sm:$0xff]  ;;  %v192_v9 = vld [vmem:[%s835_s26 + $0x90] sm:$0xff] }
  0x10   : > { %711 = vmatprep.subr.mxu0 %v207_v2  ;;  %765 = vmatprep.subr.mxu1 %v207_v2  ;;  %v177_v10 = vld [vmem:[%s835_s26 + $0x18] sm:$0xff]  ;;  %v178_v12 = vld [vmem:[%s835_s26 + $0x20] sm:$0xff]  ;;  %v179_v14 = vld [vmem:[%s835_s26 + $0x28] sm:$0xff] }
  0x11   : > { %712 = vmatpush3.msra.mxu0 %v207_v2  ;;  %769 = vmatpush3.msra.mxu1 %v207_v2  ;;  %v193_v11 = vld [vmem:[%s835_s26 + $0x98] sm:$0xff]  ;;  %v194_v13 = vld [vmem:[%s835_s26 + $0xa0] sm:$0xff]  ;;  %v195_v15 = vld [vmem:[%s835_s26 + $0xa8] sm:$0xff] }
  0x12   : > { %713 = vmatprep.subr.mxu0 %v206_v3  ;;  %766 = vmatprep.subr.mxu1 %v206_v3  ;;  %v180_v16 = vld [vmem:[%s835_s26 + $0x30] sm:$0xff]  ;;  %v181_v18 = vld [vmem:[%s835_s26 + $0x38] sm:$0xff]  ;;  %v182_v20 = vld [vmem:[%s835_s26 + $0x40] sm:$0xff] }
  0x13   : > { %714 = vmatpush3.msra.mxu0 %v206_v3  ;;  %770 = vmatpush3.msra.mxu1 %v206_v3  ;;  %v196_v17 = vld [vmem:[%s835_s26 + $0xb0] sm:$0xff]  ;;  %v197_v19 = vld [vmem:[%s835_s26 + $0xb8] sm:$0xff]  ;;  %v198_v21 = vld [vmem:[%s835_s26 + $0xc0] sm:$0xff] }
  0x14   : > { %715 = vmatprep.mubr.msk.f32.mxu0 %vm217_vm0, %v174_v4  ;;  %739 = vmatprep.mubr.msk.f32.mxu1 %vm217_vm0, %v190_v5  ;;  %v183_v22 = vld [vmem:[%s835_s26 + $0x48] sm:$0xff]  ;;  %v184_v24 = vld [vmem:[%s835_s26 + $0x50] sm:$0xff]  ;;  %v185_v26 = vld [vmem:[%s835_s26 + $0x58] sm:$0xff] }
  0x15   : > { %716 = vmatmul.mubr.msk.f32.vlgmr.msra.gmra.mxu0 %vm217_vm0, %v175_v6  ;;  %740 = vmatmul.mubr.msk.f32.vlgmr.msra.gmra.mxu1 %vm217_vm0, %v191_v7  ;;  %v199_v23 = vld [vmem:[%s835_s26 + $0xc8] sm:$0xff]  ;;  %v200_v25 = vld [vmem:[%s835_s26 + $0xd0] sm:$0xff]  ;;  %v201_v27 = vld [vmem:[%s835_s26 + $0xd8] sm:$0xff] }
  0x16   : > { %718 = vmatprep.mubr.msk.f32.mxu0 %vm217_vm0, %v176_v8  ;;  %742 = vmatprep.mubr.msk.f32.mxu1 %vm217_vm0, %v192_v9  ;;  %v186_v28 = vld [vmem:[%s835_s26 + $0x60] sm:$0xff]  ;;  %v187_v30 = vld [vmem:[%s835_s26 + $0x68] sm:$0xff]  ;;  %v188_v32 = vld [vmem:[%s835_s26 + $0x70] sm:$0xff] }
  0x17   : > { %v202_v29 = vld [vmem:[%s835_s26 + $0xe0] sm:$0xff]  ;;  %v203_v31 = vld [vmem:[%s835_s26 + $0xe8] sm:$0xff]  ;;  %v204_v33 = vld [vmem:[%s835_s26 + $0xf0] sm:$0xff] }
  0x18   : > { %v189_v34 = vld [vmem:[%s835_s26 + $0x78] sm:$0xff] }
  0x19   : > { %719 = vmatmul.mubr.msk.f32.gmra.mxu0 %vm217_vm0, %v177_v10  ;;  %743 = vmatmul.mubr.msk.f32.gmra.mxu1 %vm217_vm0, %v193_v11  ;;  %v205_v35 = vld [vmem:[%s835_s26 + $0xf8] sm:$0xff] }
  0x1a   : > { %721 = vmatprep.mubr.msk.f32.mxu0 %vm217_vm0, %v178_v12  ;;  %745 = vmatprep.mubr.msk.f32.mxu1 %vm217_vm0, %v194_v13 }
  0x1d   : > { %722 = vmatmul.mubr.msk.f32.gmra.mxu0 %vm217_vm0, %v179_v14  ;;  %746 = vmatmul.mubr.msk.f32.gmra.mxu1 %vm217_vm0, %v195_v15 }
  0x1e   : > { %724 = vmatprep.mubr.msk.f32.mxu0 %vm217_vm0, %v180_v16  ;;  %748 = vmatprep.mubr.msk.f32.mxu1 %vm217_vm0, %v196_v17 }
  0x21   : > { %725 = vmatmul.mubr.msk.f32.gmra.mxu0 %vm217_vm0, %v181_v18  ;;  %749 = vmatmul.mubr.msk.f32.gmra.mxu1 %vm217_vm0, %v197_v19 }
  0x22   : > { %727 = vmatprep.mubr.msk.f32.mxu0 %vm217_vm0, %v182_v20  ;;  %751 = vmatprep.mubr.msk.f32.mxu1 %vm217_vm0, %v198_v21 }
  0x25   : > { %728 = vmatmul.mubr.msk.f32.gmra.mxu0 %vm217_vm0, %v183_v22  ;;  %752 = vmatmul.mubr.msk.f32.gmra.mxu1 %vm217_vm0, %v199_v23 }
  0x26   : > { %730 = vmatprep.mubr.msk.f32.mxu0 %vm217_vm0, %v184_v24  ;;  %754 = vmatprep.mubr.msk.f32.mxu1 %vm217_vm0, %v200_v25 }
  0x29   : > { %731 = vmatmul.mubr.msk.f32.gmra.mxu0 %vm217_vm0, %v185_v26  ;;  %755 = vmatmul.mubr.msk.f32.gmra.mxu1 %vm217_vm0, %v201_v27 }
  0x2a   : > { %733 = vmatprep.mubr.msk.f32.mxu0 %vm217_vm0, %v186_v28  ;;  %757 = vmatprep.mubr.msk.f32.mxu1 %vm217_vm0, %v202_v29 }
  0x2d   : > { %734 = vmatmul.mubr.msk.f32.gmra.mxu0 %vm217_vm0, %v187_v30  ;;  %758 = vmatmul.mubr.msk.f32.gmra.mxu1 %vm217_vm0, %v203_v31 }
  0x2e   : > { %736 = vmatprep.mubr.msk.f32.mxu0 %vm217_vm0, %v188_v32  ;;  %760 = vmatprep.mubr.msk.f32.mxu1 %vm217_vm0, %v204_v33 }
  0x31   : > { %737 = vmatmul.mubr.msk.f32.gmra.mxu0 %vm217_vm0, %v189_v34  ;;  %761 = vmatmul.mubr.msk.f32.gmra.mxu1 %vm217_vm0, %v205_v35 }
  0xd5   : > { %v717_v37 = vpop.f32.mrf.mxu0  ;;  %v741_v38 = vpop.f32.mrf.mxu1 }
  0xd6   : > { %v386_v39 = vadd.f32 %v717_v37, %v904_v36  ;;  %v466_v40 = vadd.f32 %v741_v38, %v904_v36 }
  0xd7   : > { %v380_v41 = vpop.f32.mrf.mxu0  ;;  %v460_v42 = vpop.f32.mrf.mxu1 }
  0xd8   : > { %540 = vst.msk [vmem:[%s911_s4 + $0x8] sm:$0xff] %vm217_vm0, %v386_v39  ;;  %556 = vst.msk [vmem:[%s911_s4 + $0x88] sm:$0xff] %vm217_vm0, %v466_v40  ;;  %v381_v43 = vadd.f32 %v904_v36, %v380_v41  ;;  %v461_v44 = vadd.f32 %v904_v36, %v460_v42 }
  0xd9   : > { %v720_v45 = vpop.f32.mrf.mxu0  ;;  %v744_v46 = vpop.f32.mrf.mxu1 }
  0xda   : > { %539 = vst.msk [vmem:[%s911_s4] sm:$0xff] %vm217_vm0, %v381_v43  ;;  %555 = vst.msk [vmem:[%s911_s4 + $0x80] sm:$0xff] %vm217_vm0, %v461_v44  ;;  %v396_v47 = vadd.f32 %v720_v45, %v904_v36  ;;  %v476_v48 = vadd.f32 %v744_v46, %v904_v36 }
  0xdb   : > { %v390_v49 = vpop.f32.mrf.mxu0  ;;  %v470_v50 = vpop.f32.mrf.mxu1 }
  0xdc   : > { %542 = vst.msk [vmem:[%s911_s4 + $0x18] sm:$0xff] %vm217_vm0, %v396_v47  ;;  %558 = vst.msk [vmem:[%s911_s4 + $0x98] sm:$0xff] %vm217_vm0, %v476_v48  ;;  %v391_v51 = vadd.f32 %v904_v36, %v390_v49  ;;  %v471_v52 = vadd.f32 %v904_v36, %v470_v50 }
  0xdd   : > { %v723_v53 = vpop.f32.mrf.mxu0  ;;  %v747_v54 = vpop.f32.mrf.mxu1 }
  0xde   : > { %541 = vst.msk [vmem:[%s911_s4 + $0x10] sm:$0xff] %vm217_vm0, %v391_v51  ;;  %557 = vst.msk [vmem:[%s911_s4 + $0x90] sm:$0xff] %vm217_vm0, %v471_v52  ;;  %v406_v55 = vadd.f32 %v723_v53, %v904_v36  ;;  %v486_v56 = vadd.f32 %v747_v54, %v904_v36 }
  0xdf   : > { %v400_v57 = vpop.f32.mrf.mxu0  ;;  %v480_v58 = vpop.f32.mrf.mxu1 }
  0xe0   : > { %544 = vst.msk [vmem:[%s911_s4 + $0x28] sm:$0xff] %vm217_vm0, %v406_v55  ;;  %560 = vst.msk [vmem:[%s911_s4 + $0xa8] sm:$0xff] %vm217_vm0, %v486_v56  ;;  %v401_v59 = vadd.f32 %v904_v36, %v400_v57  ;;  %v481_v60 = vadd.f32 %v904_v36, %v480_v58 }
  0xe1   : > { %v726_v61 = vpop.f32.mrf.mxu0  ;;  %v750_v62 = vpop.f32.mrf.mxu1 }
  0xe2   : > { %543 = vst.msk [vmem:[%s911_s4 + $0x20] sm:$0xff] %vm217_vm0, %v401_v59  ;;  %559 = vst.msk [vmem:[%s911_s4 + $0xa0] sm:$0xff] %vm217_vm0, %v481_v60  ;;  %v416_v63 = vadd.f32 %v726_v61, %v904_v36  ;;  %v496_v0 = vadd.f32 %v750_v62, %v904_v36 }
  0xe3   : > { %v410_v1 = vpop.f32.mrf.mxu0  ;;  %v490_v2 = vpop.f32.mrf.mxu1 }
  0xe4   : > { %546 = vst.msk [vmem:[%s911_s4 + $0x38] sm:$0xff] %vm217_vm0, %v416_v63  ;;  %562 = vst.msk [vmem:[%s911_s4 + $0xb8] sm:$0xff] %vm217_vm0, %v496_v0  ;;  %v411_v3 = vadd.f32 %v904_v36, %v410_v1  ;;  %v491_v4 = vadd.f32 %v904_v36, %v490_v2 }
  0xe5   : > { %v729_v5 = vpop.f32.mrf.mxu0  ;;  %v753_v6 = vpop.f32.mrf.mxu1 }
  0xe6   : > { %545 = vst.msk [vmem:[%s911_s4 + $0x30] sm:$0xff] %vm217_vm0, %v411_v3  ;;  %561 = vst.msk [vmem:[%s911_s4 + $0xb0] sm:$0xff] %vm217_vm0, %v491_v4  ;;  %v426_v7 = vadd.f32 %v729_v5, %v904_v36  ;;  %v506_v8 = vadd.f32 %v753_v6, %v904_v36 }
  0xe7   : > { %v420_v9 = vpop.f32.mrf.mxu0  ;;  %v500_v10 = vpop.f32.mrf.mxu1 }
  0xe8   : > { %548 = vst.msk [vmem:[%s911_s4 + $0x48] sm:$0xff] %vm217_vm0, %v426_v7  ;;  %564 = vst.msk [vmem:[%s911_s4 + $0xc8] sm:$0xff] %vm217_vm0, %v506_v8  ;;  %v421_v11 = vadd.f32 %v904_v36, %v420_v9  ;;  %v501_v12 = vadd.f32 %v904_v36, %v500_v10 }
  0xe9   : > { %v732_v13 = vpop.f32.mrf.mxu0  ;;  %v756_v14 = vpop.f32.mrf.mxu1 }
  0xea   : > { %547 = vst.msk [vmem:[%s911_s4 + $0x40] sm:$0xff] %vm217_vm0, %v421_v11  ;;  %563 = vst.msk [vmem:[%s911_s4 + $0xc0] sm:$0xff] %vm217_vm0, %v501_v12  ;;  %v436_v15 = vadd.f32 %v732_v13, %v904_v36  ;;  %v516_v16 = vadd.f32 %v756_v14, %v904_v36 }
  0xeb   : > { %v430_v17 = vpop.f32.mrf.mxu0  ;;  %v510_v18 = vpop.f32.mrf.mxu1 }
  0xec   : > { %550 = vst.msk [vmem:[%s911_s4 + $0x58] sm:$0xff] %vm217_vm0, %v436_v15  ;;  %566 = vst.msk [vmem:[%s911_s4 + $0xd8] sm:$0xff] %vm217_vm0, %v516_v16  ;;  %v431_v19 = vadd.f32 %v904_v36, %v430_v17  ;;  %v511_v20 = vadd.f32 %v904_v36, %v510_v18 }
  0xed   : > { %v735_v21 = vpop.f32.mrf.mxu0  ;;  %v759_v22 = vpop.f32.mrf.mxu1 }
  0xee   : > { %549 = vst.msk [vmem:[%s911_s4 + $0x50] sm:$0xff] %vm217_vm0, %v431_v19  ;;  %565 = vst.msk [vmem:[%s911_s4 + $0xd0] sm:$0xff] %vm217_vm0, %v511_v20  ;;  %v446_v23 = vadd.f32 %v735_v21, %v904_v36  ;;  %v526_v24 = vadd.f32 %v759_v22, %v904_v36 }
  0xef   : > { %v440_v25 = vpop.f32.mrf.mxu0  ;;  %v520_v26 = vpop.f32.mrf.mxu1 }
  0xf0   : > { %552 = vst.msk [vmem:[%s911_s4 + $0x68] sm:$0xff] %vm217_vm0, %v446_v23  ;;  %568 = vst.msk [vmem:[%s911_s4 + $0xe8] sm:$0xff] %vm217_vm0, %v526_v24  ;;  %v441_v27 = vadd.f32 %v904_v36, %v440_v25  ;;  %v521_v28 = vadd.f32 %v904_v36, %v520_v26 }
  0xf1   : > { %v738_v29 = vpop.f32.mrf.mxu0  ;;  %v762_v30 = vpop.f32.mrf.mxu1 }
  0xf2   : > { %551 = vst.msk [vmem:[%s911_s4 + $0x60] sm:$0xff] %vm217_vm0, %v441_v27  ;;  %567 = vst.msk [vmem:[%s911_s4 + $0xe0] sm:$0xff] %vm217_vm0, %v521_v28  ;;  %v456_v31 = vadd.f32 %v738_v29, %v904_v36  ;;  %v536_v32 = vadd.f32 %v762_v30, %v904_v36 }
  0xf3   : > { %v450_v33 = vpop.f32.mrf.mxu0  ;;  %v530_v34 = vpop.f32.mrf.mxu1 }
  0xf4   : > { %554 = vst.msk [vmem:[%s911_s4 + $0x78] sm:$0xff] %vm217_vm0, %v456_v31  ;;  %570 = vst.msk [vmem:[%s911_s4 + $0xf8] sm:$0xff] %vm217_vm0, %v536_v32  ;;  %v451_v35 = vadd.f32 %v904_v36, %v450_v33  ;;  %v531_v37 = vadd.f32 %v904_v36, %v530_v34 }
  0xf6   : > { %553 = vst.msk [vmem:[%s911_s4 + $0x70] sm:$0xff] %vm217_vm0, %v451_v35  ;;  %569 = vst.msk [vmem:[%s911_s4 + $0xf0] sm:$0xff] %vm217_vm0, %v531_v37 }
  0xf7 PF: > { %s13_s12 = sadd.s32 1, %s785_s12  }
  0xf8   : > { %p10_p4 = scmp.ge.s32.totalorder %s13_s12, 4  }
  0xfa   :  { %12 = sbr.rel (!%p10_p4) target bundleno = 1 (0x1), region = 62 }

</bundles_post_ra>
